<compile_context>
chip_gen: v7x
topology: tpu7x:2x2x1
jax: 0.10.0
libtpu: 0.0.40
codegen_flags: <defaults>
</compile_context>

<pallas_src>
import math

import jax
import jax.numpy as jnp
from jax.experimental import pallas as pl
from jax.experimental.pallas import tpu as pltpu


_TARGET_BLOCK_BYTES = 4 << 20   # ~4 MiB per x/out block


# --------------------------------------------------------------------------
# Kernels
# --------------------------------------------------------------------------
def _pe_add_bcast_kernel(x_ref, pe_ref, o_ref):
    # x_ref: (tile_s, batch, tile_d); pe_ref: (tile_s, 1, tile_d) f32.
    # Size-1 batch dim broadcasts over sublanes; add in f32, cast at the store.
    o_ref[...] = (x_ref[...].astype(jnp.float32) + pe_ref[...]).astype(o_ref.dtype)


def _make_pe_add_merge_kernel(batch: int):
    def kernel(x_ref, pe_ref, o_ref):
        # x_ref: (tile_s, batch*d_model); pe_ref: (tile_s, d_model) f32.
        pe_t = pe_ref[...]
        pe_row = pe_t if batch == 1 else jnp.concatenate([pe_t] * batch, axis=1)
        o_ref[...] = (x_ref[...].astype(jnp.float32) + pe_row).astype(o_ref.dtype)
    return kernel


# --------------------------------------------------------------------------
# pe table (identical to the PyTorch __init__ buffer)
# --------------------------------------------------------------------------
def make_positional_encoding_table(d_model: int, max_len: int = 5000) -> jnp.ndarray:
    position = jnp.arange(max_len, dtype=jnp.float32)[:, None]            # (max_len, 1)
    div_term = jnp.exp(
        jnp.arange(0, d_model, 2, dtype=jnp.float32) * (-math.log(10000.0) / d_model)
    )                                                                     # (d_model//2,)
    pe = jnp.zeros((max_len, 1, d_model), dtype=jnp.float32)
    pe = pe.at[:, 0, 0::2].set(jnp.sin(position * div_term))
    pe = pe.at[:, 0, 1::2].set(jnp.cos(position * div_term))
    return pe


# --------------------------------------------------------------------------
# Tiling helpers
# --------------------------------------------------------------------------
def _round_up(x: int, m: int) -> int:
    return ((x + m - 1) // m) * m


def _choose_tile_s(seq_len: int, row_bytes: int, sublane: int,
                   target_block_bytes: int = _TARGET_BLOCK_BYTES) -> int:
    """Rows per block: ~target_block_bytes per x/out block, sublane-aligned."""
    rows = max(sublane,
               (target_block_bytes // max(row_bytes, 1)) // sublane * sublane)
    if rows >= seq_len:
        # Whole seq axis fits in one block: split into >= 2 grid steps (when the
        # sublane packing allows it) so both of v7x's TensorCores get work along
        # the "parallel" seq axis; harmless on single-TC chips.
        half = _round_up(pl.cdiv(seq_len, 2), sublane)
        rows = half if half < seq_len else seq_len
    return min(rows, seq_len)


# --------------------------------------------------------------------------
# Forward
# --------------------------------------------------------------------------
def positional_encoding_forward(x: jnp.ndarray, pe: jnp.ndarray, *,
                                donate_x: bool = False) -> jnp.ndarray:
    """x: [seq_len, batch, d_model]; pe: [max_len, 1, d_model] (f32 table)."""
    seq_len, batch, d_model = x.shape
    if pe.ndim != 3 or pe.shape[1] != 1 or pe.shape[2] != d_model:
        raise ValueError(f"pe shape {pe.shape} does not match d_model={d_model}")
    if pe.shape[0] < seq_len:
        raise ValueError(f"seq_len={seq_len} exceeds pe max_len={pe.shape[0]}")

    x_itemsize = jnp.dtype(x.dtype).itemsize
    pe_itemsize = jnp.dtype(pe.dtype).itemsize
    out_dtype = jnp.promote_types(x.dtype, pe.dtype)   # PyTorch promotion vs f32 pe
    out_itemsize = jnp.dtype(out_dtype).itemsize

    if d_model >= 128:
        # ---- 3D broadcast path (d_model already lane-dense) ----
        tile_d = 2048 if (d_model > 2048 and d_model % 128 == 0) else d_model
        row_bytes = batch * tile_d * max(x_itemsize, out_itemsize)
        tile_s = _choose_tile_s(seq_len, row_bytes, 1)
        grid = (pl.cdiv(seq_len, tile_s), pl.cdiv(d_model, tile_d))

        x_in = x
        pe_in = pe[:seq_len]                              # (seq_len, 1, d_model) f32
        in_specs = [
            pl.BlockSpec((tile_s, batch, tile_d), lambda s, d: (s, 0, d)),
            pl.BlockSpec((tile_s, 1, tile_d), lambda s, d: (s, 0, d)),
        ]
        out_specs = pl.BlockSpec((tile_s, batch, tile_d), lambda s, d: (s, 0, d))
        out_shape = jax.ShapeDtypeStruct((seq_len, batch, d_model), out_dtype)
        kernel = _pe_add_bcast_kernel
        dims = ("parallel", "parallel")
        block_bytes = (tile_s * batch * tile_d * (x_itemsize + out_itemsize)
                       + tile_s * tile_d * pe_itemsize)
    else:
        # ---- merged-lane 2D path (d_model < 128) ----
        width = batch * d_model
        sub = max(8, 32 // min(x_itemsize, out_itemsize))   # sublane packing
        row_bytes = width * max(x_itemsize, out_itemsize)
        tile_s = _choose_tile_s(seq_len, row_bytes, sub)
        grid = (pl.cdiv(seq_len, tile_s),)

        x_in = x.reshape(seq_len, width)                  # free trailing-dim merge
        pe_in = pe[:seq_len, 0, :]                        # (seq_len, d_model) f32
        in_specs = [
            pl.BlockSpec((tile_s, width), lambda s: (s, 0)),
            pl.BlockSpec((tile_s, d_model), lambda s: (s, 0)),
        ]
        out_specs = pl.BlockSpec((tile_s, width), lambda s: (s, 0))
        out_shape = jax.ShapeDtypeStruct((seq_len, width), out_dtype)
        kernel = _make_pe_add_merge_kernel(batch)
        dims = ("parallel",)
        block_bytes = (tile_s * width * (x_itemsize + out_itemsize)
                       + tile_s * d_model * pe_itemsize)

    # Double-buffered live set + headroom; 32-48 MiB is safe on every
    # generation (v7x: 64 MiB physical VMEM per TC; v5e/v6e: 128 MiB).
    vmem_limit = int(max(32 << 20, min(4 * block_bytes, 48 << 20)))

    bytes_accessed = (seq_len * batch * d_model * x_itemsize        # read x
                      + seq_len * d_model * pe_itemsize             # read pe (once)
                      + seq_len * batch * d_model * out_itemsize)   # write out

    alias = {0: 0} if (donate_x and out_dtype == x.dtype) else {}

    out = pl.pallas_call(
        kernel,
        out_shape=out_shape,
        grid_spec=pltpu.PrefetchScalarGridSpec(
            num_scalar_prefetch=0,
            grid=grid,
            in_specs=in_specs,
            out_specs=out_specs,
        ),
        compiler_params=pltpu.CompilerParams(
            dimension_semantics=dims,
            vmem_limit_bytes=vmem_limit,
        ),
        cost_estimate=pl.CostEstimate(
            flops=seq_len * batch * d_model,
            transcendentals=0,
            bytes_accessed=bytes_accessed,
        ),
        input_output_aliases=alias,
    )(x_in, pe_in)

    # Eval-mode dropout is the identity; see TODO at the top for training mode.
    return out if d_model >= 128 else out.reshape(seq_len, batch, d_model)


if __name__ == "__main__":
    root = jax.random.PRNGKey(0)
    k1, k2 = jax.random.split(root)

    # Case 1: module-sized demo shapes (d_model < 128 -> merged-lane 2D path).
    seq_len, batch, d_model = 8, 2, 32
    x = jax.random.normal(k1, (seq_len, batch, d_model), dtype=jnp.float32)
    pe = make_positional_encoding_table(d_model, max_len=5000)
    out = jax.block_until_ready(positional_encoding_forward(x, pe))
    ref = x + pe[:seq_len]
    assert out.shape == (seq_len, batch, d_model)
    assert jnp.allclose(out, ref, atol=1e-6), "2D-path mismatch vs reference"

    # Case 2: realistic transformer width (d_model >= 128 -> 3D broadcast path).
    seq_len2, batch2, d_model2 = 16, 2, 128
    x2 = jax.random.normal(k2, (seq_len2, batch2, d_model2), dtype=jnp.float32)
    pe2 = make_positional_encoding_table(d_model2, max_len=5000)
    out2 = jax.block_until_ready(positional_encoding_forward(x2, pe2))
    ref2 = x2 + pe2[:seq_len2]
    assert out2.shape == (seq_len2, batch2, d_model2)
    assert jnp.allclose(out2, ref2, atol=1e-6), "3D-path mismatch vs reference"

    print("KERNEL_OK")
</pallas_src>

<mosaic_0001>
module attributes {stable_mosaic.version = 11 : i64} {
  func.func @kernel(%arg0: i32, %arg1: memref<8x64xf32, #tpu.memory_space<vmem>>, %arg2: memref<8x32xf32, #tpu.memory_space<vmem>>, %arg3: memref<8x64xf32, #tpu.memory_space<vmem>>) attributes {dimension_semantics = [#tpu.dimension_semantics<parallel>], iteration_bounds = array<i64: 1>, scalar_prefetch = 0 : i64, scratch_operands = 0 : i64, tpu.core_type = #tpu.core_type<tc>, window_params = [{transform_indices = @transform_0, window_bounds = array<i64: 8, 64>}, {transform_indices = @transform_1, window_bounds = array<i64: 8, 32>}, {transform_indices = @transform_2, window_bounds = array<i64: 8, 64>}]} {
    %c0 = arith.constant 0 : index
    %c0_0 = arith.constant 0 : index
    %0 = vector.load %arg2[%c0, %c0_0] : memref<8x32xf32, #tpu.memory_space<vmem>>, vector<8x32xf32>
    %1 = tpu.concatenate %0, %0 in 1 : vector<8x32xf32>, vector<8x32xf32> -> vector<8x64xf32>
    %c0_1 = arith.constant 0 : index
    %c0_2 = arith.constant 0 : index
    %2 = vector.load %arg1[%c0_1, %c0_2] : memref<8x64xf32, #tpu.memory_space<vmem>>, vector<8x64xf32>
    %3 = arith.addf %2, %1 : vector<8x64xf32>
    %c0_3 = arith.constant 0 : index
    %c0_4 = arith.constant 0 : index
    %4 = vector.load %arg3[%c0_3, %c0_4] : memref<8x64xf32, #tpu.memory_space<vmem>>, vector<8x64xf32>
    tpu.vector_store %arg3[%c0_3, %c0_4], %3 {strides = array<i32>} : memref<8x64xf32, #tpu.memory_space<vmem>>, vector<8x64xf32>,
    return
  }
  func.func @transform_0(%arg0: i32) -> (i32, i32) {
    %c0_i32 = arith.constant 0 : i32
    %c0_i32_0 = arith.constant 0 : i32
    return %arg0, %c0_i32 : i32, i32
  }
  func.func @transform_1(%arg0: i32) -> (i32, i32) {
    %c0_i32 = arith.constant 0 : i32
    %c0_i32_0 = arith.constant 0 : i32
    return %arg0, %c0_i32 : i32, i32
  }
  func.func @transform_2(%arg0: i32) -> (i32, i32) {
    %c0_i32 = arith.constant 0 : i32
    %c0_i32_0 = arith.constant 0 : i32
    return %arg0, %c0_i32 : i32, i32
  }
}

</mosaic_0001>

<bundles_post_ra>
// kernel: tpu_custom_call.1
= control target key start
LH: loop header
LB: loop body
LE: loop exit
PB: predicated region body
PF: predicated region fallthrough
CT: control target
= control target key end

     0   :  { %7 = vsyncpa [#allocation3], 0  ;;  %s194_s0 = inlined_call_operand.hbm [shape: f32[8,64], index: 0, kind: input, shape index: {}]   ;;  %s195_s1 = inlined_call_operand.hbm [shape: f32[8,32], index: 1, kind: input, shape index: {}]   ;;  %s196_s2 = inlined_call_operand.hbm [shape: f32[8,64], index: 2, kind: output, shape index: {}]  }
   0x1   :  { %8 = vsyncpa [#allocation6], 0 }
   0x2   :  { %9 = vsyncpa [#allocation4], 0  ;;  %s139_s9 = smov [#allocation2]   ;;  %s140_s11 = smov [#allocation5]  }
   0x3   :  { %s16_s10 = sshll.u32 %s139_s9, 4  ;;  %s26_s12 = sshll.u32 %s140_s11, 4  ;;  %s17_s10 = int_to_ptr.vmem [resolvable:$true] %s16_s10  ;;  %s27_s12 = int_to_ptr.vmem [resolvable:$true] %s26_s12 }
   0x4   :  { %s67_s15 = scalar_lea.hbm %s194_s0, 128 }
   0x5   :  { %p68_p0 = scmp.ne.s32.totalorder %s194_s0, %s67_s15  ;;  %p71_p1 = scmp.lt.u32.totalorder %s67_s15, %s194_s0 }
   0x7   :  { %p73_p2 = pnand %p71_p1, %p68_p0 }
   0x9   :  { %76 = shalt.err (!%p73_p2)
}
   0xa   :  { %s77_s20 = scalar_lea.vmem %s17_s10, 128  ;;  %p82_p4 = scmp.lt.s32.totalorder %s17_s10, %s17_s10 }
   0xb   :  { %p78_p3 = scmp.ne.s32.totalorder %s17_s10, %s77_s20  ;;  %p83_p5 = scmp.lt.s32.totalorder %s77_s20, %s77_s20 }
   0xd   :  { %p84_p6 = por %p83_p5, %p82_p4 }
   0xf   :  { %p85_p7 = pnand %p84_p6, %p78_p3 }
  0x11   :  { %88 = shalt.err (!%p85_p7)
}
  0x12   :  { %19 = dma.hbm_to_vmem [thread:$0]  %s194_s0, 128, %s17_s10, [#allocation3]  }
  0x13   :  { %s89_s25 = scalar_lea.hbm %s195_s1, 128 }
  0x14   :  { %p90_p8 = scmp.ne.s32.totalorder %s195_s1, %s89_s25  ;;  %p93_p9 = scmp.lt.u32.totalorder %s89_s25, %s195_s1 }
  0x16   :  { %p95_p10 = pnand %p93_p9, %p90_p8 }
  0x18   :  { %98 = shalt.err (!%p95_p10)
}
  0x19   :  { %s99_s30 = scalar_lea.vmem %s27_s12, 128  ;;  %p104_p12 = scmp.lt.s32.totalorder %s27_s12, %s27_s12 }
  0x1a   :  { %p100_p11 = scmp.ne.s32.totalorder %s27_s12, %s99_s30  ;;  %p105_p13 = scmp.lt.s32.totalorder %s99_s30, %s99_s30 }
  0x1c   :  { %p106_p0 = por %p105_p13, %p104_p12 }
  0x1e   :  { %p107_p1 = pnand %p106_p0, %p100_p11 }
  0x20   :  { %110 = shalt.err (!%p107_p1)
}
  0x21   :  { %29 = dma.hbm_to_vmem [thread:$0]  %s195_s1, 128, %s27_s12, [#allocation6]  }
  0x22   :  { %133 = dma.done.wait [#allocation3], 128  }
  0x23   :  { %134 = vsyncadd [#allocation3], 4294967168 }
  0x24   :  { %135 = dma.done.wait [#allocation6], 128  }
  0x25   :  { %136 = vsyncadd [#allocation6], 4294967168  ;;  %v36_v0 = vld [vmem:[#allocation5] sm:$0xff]  ;;  %s141_s4 = smov 32   ;;  %vm41_vm0 = vcmask 261120   ;;  %v43_v1 = vld [vmem:[#allocation2] sm:$0xff] }
  0x26   :  { %38 = vrot.lane.b32.xlu0 %v36_v0, %s141_s4  ;;  %s142_s5 = smov [#allocation7]   ;;  %vm45_vm1 = vcmask 523264  }
  0x27   :  { %s53_s6 = sshll.u32 %s142_s5, 4  ;;  %s54_s6 = int_to_ptr.vmem [resolvable:$true] %s53_s6 }
  0x28   :  { %s111_s7 = scalar_lea.vmem %s54_s6, 128  ;;  %p116_p3 = scmp.lt.s32.totalorder %s54_s6, %s54_s6 }
  0x29   :  { %p112_p2 = scmp.ne.s32.totalorder %s54_s6, %s111_s7  ;;  %p117_p4 = scmp.lt.s32.totalorder %s111_s7, %s111_s7 }
  0x2b   :  { %p118_p5 = por %p117_p4, %p116_p3 }
  0x2d   :  { %p119_p6 = pnand %p118_p5, %p112_p2 }
  0x98   :  { %v39_v2 = vpop.permute.xlu0 %38 }
  0x99   :  { %v42_v3 = vsel %vm41_vm0, %v36_v0, %v39_v2 }
  0x9a   :  { %v44_v4 = vadd.f32 %v43_v1, %v42_v3 }
  0x9c   :  { %46 = vst.msk [vmem:[#allocation7] sm:$0xff] %vm45_vm1, %v44_v4 }
  0x9d   :  { %122 = shalt.err (!%p119_p6)
}
  0x9e   :  { %s123_s9 = scalar_lea.hbm %s196_s2, 128 }
  0x9f   :  { %p124_p7 = scmp.ne.s32.totalorder %s196_s2, %s123_s9  ;;  %p127_p8 = scmp.lt.u32.totalorder %s123_s9, %s196_s2 }
  0xa1   :  { %p129_p9 = pnand %p127_p8, %p124_p7 }
  0xa3   :  { %132 = shalt.err (!%p129_p9)
}
  0xa4   :  { %56 = dma.vmem_to_hbm [thread:$0]  %s54_s6, 128, %s196_s2, [#allocation4]  }
  0xa5   :  { %137 = dma.done.wait [#allocation4], 128  }
  0xa6   :  { %138 = vsyncadd [#allocation4], 4294967168 }
  0xa7   :  { %60 = vsyncpa [#allocation3], 1 }
  0xa8   :  { %61 = vsyncpa [#allocation6], 1 }
  0xa9   :  { %62 = vsyncpa [#allocation4], 1 }

</bundles_post_ra>
